<compile_context>
chip_gen: v6e
topology: v6e:2x2x1
jax: 0.10.0
libtpu: 0.0.40
codegen_flags: <defaults>
</compile_context>

<pallas_src>
import functools

import jax
import jax.numpy as jnp
from jax.experimental import pallas as pl
from jax.experimental.pallas import tpu as pltpu


def _round_up(v, m):
    return ((v + m - 1) // m) * m


def _pad2d(arr, rows, cols):
    return jnp.pad(arr, ((0, rows - arr.shape[0]), (0, cols - arr.shape[1])))


def sage_encoder_kernel(a_ref, xf_ref, xt_ref, wl_ref, wr_ref, bl_ref,
                        w1_ref, b1_ref, o_ref, *, nodes_per_graph):
    # ---- SAGEConv mean aggregation for this row tile:  A_tile @ X_full ----
    agg = jnp.dot(a_ref[...], xf_ref[...], preferred_element_type=jnp.float32)

    # lin_l (aggregated, with bias) + lin_r (root, no bias), then ReLU.
    x_t = xt_ref[...].astype(jnp.float32)
    h = (jnp.dot(agg, wl_ref[...], preferred_element_type=jnp.float32)
         + jnp.dot(x_t, wr_ref[...], preferred_element_type=jnp.float32)
         + bl_ref[...])
    h = jnp.maximum(h, 0.0)

    # ---- linear1: hidden -> 2*z_dim (lane-padded to 128) ----
    y = jnp.dot(h, w1_ref[...], preferred_element_type=jnp.float32) + b1_ref[...]

    # ---- per-graph mean.  Graphs are contiguous blocks of `nodes_per_graph`
    # rows that never cross a tile boundary.  Build the (gpt, TILE_N) averaging
    # weight in-kernel (iota + compare), so it costs zero HBM/VMEM traffic.
    tile_n = y.shape[0]
    gpt = tile_n // nodes_per_graph                      # graphs in this tile
    g_row = jax.lax.broadcasted_iota(jnp.int32, (gpt, tile_n), 0)
    n_col = jax.lax.broadcasted_iota(jnp.int32, (gpt, tile_n), 1)
    lower = g_row * nodes_per_graph
    in_graph = (n_col >= lower) & (n_col < lower + nodes_per_graph)
    mean_w = jnp.where(in_graph, jnp.float32(1.0 / nodes_per_graph),
                       jnp.float32(0.0))
    o_ref[...] = jnp.dot(mean_w, y, preferred_element_type=jnp.float32)


def sage_encoder_forward(x, edge_index, batch_size, params, *,
                         tile_n=None, stream_dtype=jnp.float32):
    """x: (N, C) float32 node features; edge_index: (2, E) int32 [src; dst].

    Nodes are contiguous per graph with N == batch_size * nodes_per_graph
    (what torch.reshape(x, (batch_size, -1, F)) in the reference implies).
    """
    N, C = x.shape
    H = params["w_l"].shape[1]
    Z2 = params["w_lin"].shape[1]
    assert N % batch_size == 0
    npg = N // batch_size                                # nodes per graph

    # Row-tile size: multiple of nodes_per_graph (graphs never straddle a tile)
    # and of 8 (sublane), dividing N.  When scaling N, keep 2*TILE_N*N*itemsize
    # well under the target chip's VMEM (v7x: 64 MiB physical).
    if tile_n is None:
        tile_n = N
    assert N % tile_n == 0 and tile_n % npg == 0 and tile_n % 8 == 0
    gpt = tile_n // npg                                  # graphs per tile
    assert gpt % 8 == 0 or gpt == batch_size, (
        "graphs-per-tile must be a multiple of 8 (sublane) or cover the batch")

    # Dense mean-aggregation matrix: A[i, j] = 1/deg_in(i) per edge j -> i,
    # zero rows for isolated nodes (matches PyG SAGEConv mean aggregation).
    # It is streamed row-tile by row-tile from HBM (never resident in full).
    src, dst = edge_index[0], edge_index[1]
    a = jnp.zeros((N, N), jnp.float32).at[dst, src].add(1.0)
    deg = jnp.sum(a, axis=1, keepdims=True)
    a = jnp.where(deg > 0, a / jnp.maximum(deg, 1.0), 0.0)

    # Lane-pad the weight path: padded columns stay exactly zero through the
    # ReLU and linear1, so slicing the output afterwards is exact.
    Hp = _round_up(H, 128)
    Z2p = _round_up(Z2, 128)
    wl = _pad2d(params["w_l"].astype(jnp.float32), C, Hp)
    wr = _pad2d(params["w_r"].astype(jnp.float32), C, Hp)
    bl = _pad2d(params["b_l"].astype(jnp.float32), 1, Hp)
    w1 = _pad2d(params["w_lin"].astype(jnp.float32), Hp, Z2p)
    b1 = _pad2d(params["b_lin"].astype(jnp.float32), 1, Z2p)

    # Optionally stream the node-indexed operands (A dominates HBM traffic) in
    # bf16; the kernel accumulates in f32.
    a_s = a.astype(stream_dtype)
    x_s = x.astype(stream_dtype)

    operands = (a_s, x_s, x_s, wl, wr, bl, w1, b1)

    grid = (N // tile_n,)
    in_specs = [
        pl.BlockSpec((tile_n, N), lambda i: (i, 0)),     # A row tile (streamed)
        pl.BlockSpec((N, C), lambda i: (0, 0)),          # X full (for aggregation)
        pl.BlockSpec((tile_n, C), lambda i: (i, 0)),     # X tile (root term)
        pl.BlockSpec((C, Hp), lambda i: (0, 0)),         # W_l
        pl.BlockSpec((C, Hp), lambda i: (0, 0)),         # W_r
        pl.BlockSpec((1, Hp), lambda i: (0, 0)),         # b_l
        pl.BlockSpec((Hp, Z2p), lambda i: (0, 0)),       # W_lin
        pl.BlockSpec((1, Z2p), lambda i: (0, 0)),        # b_lin
    ]
    out_specs = pl.BlockSpec((gpt, Z2p), lambda i: (i, 0))

    # Explicit VMEM budget (every operand is at most double-buffered).
    item = jnp.dtype(stream_dtype).itemsize
    est = 2 * (tile_n * N * item + N * C * item + tile_n * C * item
               + 4 * (2 * C * Hp + Hp + Hp * Z2p + Z2p + gpt * Z2p))
    vmem_limit = int(max(2 * est, 32 * 1024 * 1024))

    cost = pl.CostEstimate(
        flops=int(2 * N * N * C + 4 * N * C * H + 2 * N * H * Z2
                  + 2 * batch_size * npg * Z2),
        transcendentals=0,
        bytes_accessed=int(sum(op.size * op.dtype.itemsize for op in operands)
                           + batch_size * Z2p * 4),
    )

    out_padded = pl.pallas_call(
        functools.partial(sage_encoder_kernel, nodes_per_graph=npg),
        out_shape=jax.ShapeDtypeStruct((batch_size, Z2p), jnp.float32),
        grid=grid,
        in_specs=in_specs,
        out_specs=out_specs,
        compiler_params=pltpu.CompilerParams(
            dimension_semantics=("parallel",),
            vmem_limit_bytes=vmem_limit),
        cost_estimate=cost,
    )(*operands)

    return out_padded[:, :Z2]


def init_params(key, in_channels, hidden_channels, z_dim):
    k1, k2, k3, k4, k5 = jax.random.split(key, 5)
    s_in = 1.0 / jnp.sqrt(jnp.float32(in_channels))
    s_h = 1.0 / jnp.sqrt(jnp.float32(hidden_channels))
    return {
        # SAGEConv.lin_l (aggregated neighbors, with bias), lin_r (root, no bias)
        "w_l": jax.random.uniform(k1, (in_channels, hidden_channels),
                                  jnp.float32, -s_in, s_in),
        "w_r": jax.random.uniform(k2, (in_channels, hidden_channels),
                                  jnp.float32, -s_in, s_in),
        "b_l": jax.random.uniform(k3, (1, hidden_channels),
                                  jnp.float32, -s_in, s_in),
        # linear1: hidden -> 2*z_dim, with bias
        "w_lin": jax.random.uniform(k4, (hidden_channels, 2 * z_dim),
                                    jnp.float32, -s_h, s_h),
        "b_lin": jax.random.uniform(k5, (1, 2 * z_dim),
                                    jnp.float32, -s_h, s_h),
    }


def reference_forward(x, edge_index, batch_size, params):
    """Pure-JAX reference of the PyTorch forward, for correctness check."""
    N = x.shape[0]
    src, dst = edge_index[0], edge_index[1]
    a = jnp.zeros((N, N), jnp.float32).at[dst, src].add(1.0)
    deg = jnp.sum(a, axis=1, keepdims=True)
    a = jnp.where(deg > 0, a / jnp.maximum(deg, 1.0), 0.0)
    h = a @ x @ params["w_l"] + x @ params["w_r"] + params["b_l"]
    h = jnp.maximum(h, 0.0)
    y = h @ params["w_lin"] + params["b_lin"]
    y = y.reshape(batch_size, -1, y.shape[1])
    return y.mean(axis=1)


if __name__ == "__main__":
    # Small, module-consistent shapes (multiple grid steps to exercise tiling).
    in_channels = 4
    hidden_channels = 32
    z_dim = 16
    batch_size = 16
    nodes_per_graph = 8
    N = batch_size * nodes_per_graph          # 128 nodes
    tile_n = 64                               # 2 grid steps, 8 graphs per tile

    key = jax.random.PRNGKey(0)
    k_x, k_p = jax.random.split(key)
    x = jax.random.normal(k_x, (N, in_channels), jnp.float32)

    # Deterministic edge_index: bidirectional ring inside each graph.
    src_list, dst_list = [], []
    for g in range(batch_size):
        base = g * nodes_per_graph
        for i in range(nodes_per_graph):
            u = base + i
            v = base + (i + 1) % nodes_per_graph
            src_list += [u, v]
            dst_list += [v, u]
    edge_index = jnp.array([src_list, dst_list], dtype=jnp.int32)

    params = init_params(k_p, in_channels, hidden_channels, z_dim)
    ref = reference_forward(x, edge_index, batch_size, params)

    # f32 streamed path (matches reference to tight tolerance).
    out = sage_encoder_forward(x, edge_index, batch_size, params, tile_n=tile_n)
    out = jax.block_until_ready(out)
    assert out.shape == (batch_size, 2 * z_dim)
    assert jnp.allclose(out, ref, atol=1e-5, rtol=1e-5), "f32 mismatch vs reference"

    # bf16-streamed A/X path (halves HBM traffic on the dominant A stream).
    out_bf16 = sage_encoder_forward(x, edge_index, batch_size, params,
                                    tile_n=tile_n, stream_dtype=jnp.bfloat16)
    out_bf16 = jax.block_until_ready(out_bf16)
    assert jnp.allclose(out_bf16, ref, atol=5e-2, rtol=5e-2), "bf16 mismatch vs reference"

    print("KERNEL_OK")
</pallas_src>

<mosaic_0001>
module attributes {stable_mosaic.version = 11 : i64} {
  func.func @sage_encoder_kernel(%arg0: i32, %arg1: memref<64x128xf32, #tpu.memory_space<vmem>>, %arg2: memref<128x4xf32, #tpu.memory_space<vmem>>, %arg3: memref<64x4xf32, #tpu.memory_space<vmem>>, %arg4: memref<4x128xf32, #tpu.memory_space<vmem>>, %arg5: memref<4x128xf32, #tpu.memory_space<vmem>>, %arg6: memref<1x128xf32, #tpu.memory_space<vmem>>, %arg7: memref<128x128xf32, #tpu.memory_space<vmem>>, %arg8: memref<1x128xf32, #tpu.memory_space<vmem>>, %arg9: memref<8x128xf32, #tpu.memory_space<vmem>>) attributes {dimension_semantics = [#tpu.dimension_semantics<parallel>], iteration_bounds = array<i64: 2>, scalar_prefetch = 0 : i64, scratch_operands = 0 : i64, tpu.core_type = #tpu.core_type<tc>, window_params = [{transform_indices = @transform_0, window_bounds = array<i64: 64, 128>}, {pipeline_mode = #tpu.pipeline_mode<synchronous>, transform_indices = @transform_1, window_bounds = array<i64: 128, 4>}, {transform_indices = @transform_2, window_bounds = array<i64: 64, 4>}, {pipeline_mode = #tpu.pipeline_mode<synchronous>, transform_indices = @transform_3, window_bounds = array<i64: 4, 128>}, {pipeline_mode = #tpu.pipeline_mode<synchronous>, transform_indices = @transform_4, window_bounds = array<i64: 4, 128>}, {pipeline_mode = #tpu.pipeline_mode<synchronous>, transform_indices = @transform_5, window_bounds = array<i64: 1, 128>}, {pipeline_mode = #tpu.pipeline_mode<synchronous>, transform_indices = @transform_6, window_bounds = array<i64: 128, 128>}, {pipeline_mode = #tpu.pipeline_mode<synchronous>, transform_indices = @transform_7, window_bounds = array<i64: 1, 128>}, {transform_indices = @transform_8, window_bounds = array<i64: 8, 128>}]} {
    %c0 = arith.constant 0 : index
    %c0_0 = arith.constant 0 : index
    %0 = vector.load %arg1[%c0, %c0_0] : memref<64x128xf32, #tpu.memory_space<vmem>>, vector<64x128xf32>
    %c0_1 = arith.constant 0 : index
    %c0_2 = arith.constant 0 : index
    %1 = vector.load %arg2[%c0_1, %c0_2] : memref<128x4xf32, #tpu.memory_space<vmem>>, vector<128x4xf32>
    %cst = arith.constant dense<0.000000e+00> : vector<64x4xf32>
    %2 = tpu.matmul %0, %1, %cst {dimension_numbers = #tpu.dot_dimension_numbers<[1], [0], [0], [1], [0, 0, 1, 1], [], []>} : vector<64x128xf32>, vector<128x4xf32>, vector<64x4xf32> -> vector<64x4xf32>
    %c0_3 = arith.constant 0 : index
    %c0_4 = arith.constant 0 : index
    %3 = vector.load %arg3[%c0_3, %c0_4] : memref<64x4xf32, #tpu.memory_space<vmem>>, vector<64x4xf32>
    %c0_5 = arith.constant 0 : index
    %c0_6 = arith.constant 0 : index
    %4 = vector.load %arg4[%c0_5, %c0_6] : memref<4x128xf32, #tpu.memory_space<vmem>>, vector<4x128xf32>
    %cst_7 = arith.constant dense<0.000000e+00> : vector<64x128xf32>
    %5 = tpu.matmul %2, %4, %cst_7 {dimension_numbers = #tpu.dot_dimension_numbers<[1], [0], [0], [1], [0, 0, 1, 1], [], []>} : vector<64x4xf32>, vector<4x128xf32>, vector<64x128xf32> -> vector<64x128xf32>
    %c0_8 = arith.constant 0 : index
    %c0_9 = arith.constant 0 : index
    %6 = vector.load %arg5[%c0_8, %c0_9] : memref<4x128xf32, #tpu.memory_space<vmem>>, vector<4x128xf32>
    %cst_10 = arith.constant dense<0.000000e+00> : vector<64x128xf32>
    %7 = tpu.matmul %3, %6, %cst_10 {dimension_numbers = #tpu.dot_dimension_numbers<[1], [0], [0], [1], [0, 0, 1, 1], [], []>} : vector<64x4xf32>, vector<4x128xf32>, vector<64x128xf32> -> vector<64x128xf32>
    %8 = arith.addf %5, %7 : vector<64x128xf32>
    %c0_11 = arith.constant 0 : index
    %c0_12 = arith.constant 0 : index
    %9 = vector.load %arg6[%c0_11, %c0_12] : memref<1x128xf32, #tpu.memory_space<vmem>>, vector<1x128xf32>
    %10 = vector.broadcast %9 : vector<1x128xf32> to vector<64x128xf32>
    %11 = arith.addf %8, %10 : vector<64x128xf32>
    %cst_13 = arith.constant 0.000000e+00 : f32
    %12 = vector.broadcast %cst_13 : f32 to vector<64x128xf32>
    %13 = arith.maximumf %11, %12 : vector<64x128xf32>
    %c0_14 = arith.constant 0 : index
    %c0_15 = arith.constant 0 : index
    %14 = vector.load %arg7[%c0_14, %c0_15] : memref<128x128xf32, #tpu.memory_space<vmem>>, vector<128x128xf32>
    %cst_16 = arith.constant dense<0.000000e+00> : vector<64x128xf32>
    %15 = tpu.matmul %13, %14, %cst_16 {dimension_numbers = #tpu.dot_dimension_numbers<[1], [0], [0], [1], [0, 0, 1, 1], [], []>} : vector<64x128xf32>, vector<128x128xf32>, vector<64x128xf32> -> vector<64x128xf32>
    %c0_17 = arith.constant 0 : index
    %c0_18 = arith.constant 0 : index
    %16 = vector.load %arg8[%c0_17, %c0_18] : memref<1x128xf32, #tpu.memory_space<vmem>>, vector<1x128xf32>
    %17 = vector.broadcast %16 : vector<1x128xf32> to vector<64x128xf32>
    %18 = arith.addf %15, %17 : vector<64x128xf32>
    %19 = tpu.iota {dimensions = array<i32: 0>} : vector<8x64xi32>
    %20 = tpu.iota {dimensions = array<i32: 1>} : vector<8x64xi32>
    %c8_i32 = arith.constant 8 : i32
    %21 = vector.broadcast %c8_i32 : i32 to vector<8x64xi32>
    %22 = arith.muli %19, %21 : vector<8x64xi32>
    %23 = arith.cmpi sge, %20, %22 : vector<8x64xi32>
    %c8_i32_19 = arith.constant 8 : i32
    %24 = vector.broadcast %c8_i32_19 : i32 to vector<8x64xi32>
    %25 = arith.addi %22, %24 : vector<8x64xi32>
    %26 = arith.cmpi slt, %20, %25 : vector<8x64xi32>
    %27 = arith.andi %23, %26 : vector<8x64xi1>
    %cst_20 = arith.constant 1.250000e-01 : f32
    %cst_21 = arith.constant 0.000000e+00 : f32
    %28 = vector.broadcast %cst_20 : f32 to vector<8x64xf32>
    %29 = vector.broadcast %cst_21 : f32 to vector<8x64xf32>
    %30 = arith.select %27, %28, %29 : vector<8x64xi1>, vector<8x64xf32>
    %cst_22 = arith.constant dense<0.000000e+00> : vector<8x128xf32>
    %31 = tpu.matmul %30, %18, %cst_22 {dimension_numbers = #tpu.dot_dimension_numbers<[1], [0], [0], [1], [0, 0, 1, 1], [], []>} : vector<8x64xf32>, vector<64x128xf32>, vector<8x128xf32> -> vector<8x128xf32>
    %c0_23 = arith.constant 0 : index
    %c0_24 = arith.constant 0 : index
    %32 = vector.load %arg9[%c0_23, %c0_24] : memref<8x128xf32, #tpu.memory_space<vmem>>, vector<8x128xf32>
    tpu.vector_store %arg9[%c0_23, %c0_24], %31 {strides = array<i32>} : memref<8x128xf32, #tpu.memory_space<vmem>>, vector<8x128xf32>,
    return
  }
  func.func @transform_0(%arg0: i32) -> (i32, i32) {
    %c0_i32 = arith.constant 0 : i32
    %c0_i32_0 = arith.constant 0 : i32
    return %arg0, %c0_i32 : i32, i32
  }
  func.func @transform_1(%arg0: i32) -> (i32, i32) {
    %c0_i32 = arith.constant 0 : i32
    %c0_i32_0 = arith.constant 0 : i32
    %c0_i32_1 = arith.constant 0 : i32
    return %c0_i32, %c0_i32_0 : i32, i32
  }
  func.func @transform_2(%arg0: i32) -> (i32, i32) {
    %c0_i32 = arith.constant 0 : i32
    %c0_i32_0 = arith.constant 0 : i32
    return %arg0, %c0_i32 : i32, i32
  }
  func.func @transform_3(%arg0: i32) -> (i32, i32) {
    %c0_i32 = arith.constant 0 : i32
    %c0_i32_0 = arith.constant 0 : i32
    %c0_i32_1 = arith.constant 0 : i32
    return %c0_i32, %c0_i32_0 : i32, i32
  }
  func.func @transform_4(%arg0: i32) -> (i32, i32) {
    %c0_i32 = arith.constant 0 : i32
    %c0_i32_0 = arith.constant 0 : i32
    %c0_i32_1 = arith.constant 0 : i32
    return %c0_i32, %c0_i32_0 : i32, i32
  }
  func.func @transform_5(%arg0: i32) -> (i32, i32) {
    %c0_i32 = arith.constant 0 : i32
    %c0_i32_0 = arith.constant 0 : i32
    %c0_i32_1 = arith.constant 0 : i32
    return %c0_i32, %c0_i32_0 : i32, i32
  }
  func.func @transform_6(%arg0: i32) -> (i32, i32) {
    %c0_i32 = arith.constant 0 : i32
    %c0_i32_0 = arith.constant 0 : i32
    %c0_i32_1 = arith.constant 0 : i32
    return %c0_i32, %c0_i32_0 : i32, i32
  }
  func.func @transform_7(%arg0: i32) -> (i32, i32) {
    %c0_i32 = arith.constant 0 : i32
    %c0_i32_0 = arith.constant 0 : i32
    %c0_i32_1 = arith.constant 0 : i32
    return %c0_i32, %c0_i32_0 : i32, i32
  }
  func.func @transform_8(%arg0: i32) -> (i32, i32) {
    %c0_i32 = arith.constant 0 : i32
    %c0_i32_0 = arith.constant 0 : i32
    return %arg0, %c0_i32 : i32, i32
  }
}

</mosaic_0001>

<bundles_post_ra>
// kernel: tpu_custom_call.1
= control target key start
LH: loop header
LB: loop body
LE: loop exit
PB: predicated region body
PF: predicated region fallthrough
CT: control target
= control target key end

     0   :  { %13 = vsyncpa [#allocation3], 0  ;;  %s1698_s0 = inlined_call_operand.vmem [shape: f32[128,128], index: 0, kind: input, shape index: {}]   ;;  %s1699_s1 = inlined_call_operand.vmem [shape: f32[128,4], index: 1, kind: input, shape index: {}]   ;;  %s1700_s2 = inlined_call_operand.vmem [shape: f32[128,4], index: 2, kind: input, shape index: {}]   ;;  %s1701_s3 = inlined_call_operand.vmem [shape: f32[4,128], index: 3, kind: input, shape index: {}]   ;;  %s1702_s4 = inlined_call_operand.vmem [shape: f32[4,128], index: 4, kind: input, shape index: {}]   ;;  %s1703_s5 = inlined_call_operand.vmem [shape: f32[1,128], index: 5, kind: input, shape index: {}]   ;;  %s1704_s6 = inlined_call_operand.vmem [shape: f32[128,128], index: 6, kind: input, shape index: {}]   ;;  %s1705_s7 = inlined_call_operand.vmem [shape: f32[1,128], index: 7, kind: input, shape index: {}]   ;;  %s1706_s8 = inlined_call_operand.hbm [shape: f32[16,128], index: 8, kind: output, shape index: {}]  }
   0x1   :  { %15 = vsyncpa [#allocation3 + $0x1], 0  ;;  %s1449_s27 = smov 0   ;;  %s1451_s28 = smov 0  }
   0x2   :  { %s1453_s29 = smov 0   ;;  %s1455_s30 = smov 0  }
   0x3 LB: > { %s1470_s9 = sadd.s32 4294967295, %s1399_s30   ;;  %s1054_s10 = sadd.s32 4294967294, %s1399_s30   ;;  %s1399_s30 = sphi %s1455_s30, %s1712_s30   ;;  %s1395_s29 = sphi %s1453_s29, %s1711_s29   ;;  %s1391_s28 = sphi %s1451_s28, %s1710_s28   ;;  %s1387_s27 = sphi %s1449_s27, %s1709_s27  }
   0x4   : > { %s1474_s11 = sadd.s32 1, %s1399_s30   ;;  %s206_s12 = sadd.s32 1, %s1395_s29 }
   0x5   : > { %s203_s13 = ssub.s32 %s1399_s30, %s1474_s11  ;;  %p216_p0 = scmp.ne.s32.totalorder %s1395_s29, %s1391_s28 }
   0x6   : > { %p204_p1 = scmp.eq.s32.totalorder %s203_s13, 0  ;;  %p217_p2 = scmp.eq.s32.totalorder %s1470_s9, 1 }
   0x7   : > { %p222_p3 = scmp.ne.s32.totalorder %s1391_s28, %s1387_s27  ;;  %p223_p4 = scmp.eq.s32.totalorder %s1054_s10, 1 }
   0x8   : > { %s1485_s14 = scalar_select %p204_p1, %s1395_s29, %s206_s12  }
   0x9   : > { %p1487_p5 = por %p217_p2, %p216_p0  ;;  %p1491_p6 = por %p223_p4, %p222_p3 }
   0xa   : > { %p1057_p7 = scmp.ge.s32.totalorder %s1399_s30, 1  ;;  %p277_p8 = scmp.lt.s32.totalorder %s1399_s30, 3 }
   0xc   : > { %p278_p9 = pnand %p1057_p7, %p277_p8 }
   0xd   : > { %s1059_s21 = sshll.u32 (!%p278_p9), %s1470_s9, 3  ;;  %s313_s22 = sand.u32 (!%p278_p9), 1, %s1391_s28  }
   0xe   : > { %281 = sbr.rel (%p278_p9) target bundleno = 879 (0x36f), region = 52  ;;  %p317_p10 = scmp.lt.s32.totalorder (!%p278_p9), %s1059_s21, 15 }
   0xf   : > { %s1058_s23 = sshll.u32 (!%p278_p9), %s313_s22, 3  ;;  %s1085_s10 = sshll.u32 (!%p278_p9), %s1470_s9, 7 }
  0x10   : > { %s315_s24 = scalar_lea.vmem (!%p278_p9), [#allocation2], %s1058_s23  ;;  %s1659_s13 = scalar_lea.hbm (!%p278_p9), %s1706_s8, %s1085_s10 }
  0x11   : > { %s983_s25 = sshll.u32 (!%p278_p9), %s315_s24, 4  ;;  %s1403_s9 = smov (!%p278_p9), [#allocation2]   ;;  %s1654_s25 = int_to_ptr.vmem [resolvable:$true] %s983_s25 }
  0x12   : > { %s1339_s17 = scalar_lea.vmem (!%p278_p9), %s1654_s25, 128  ;;  %s1343_s18 = sshll.u32 (!%p278_p9), %s1403_s9, 4  ;;  %s1344_s18 = int_to_ptr.vmem [resolvable:$false] %s1343_s18 }
  0x13   : > { %v351_v0 = vld [vmem:[%s1699_s1 + $0x78] sm:$0xff]  ;;  %v350_v1 = vld [vmem:[%s1699_s1 + $0x70] sm:$0xff]  ;;  %v349_v2 = vld [vmem:[%s1699_s1 + $0x68] sm:$0xff]  ;;  %s1714_s21 = smov (!%p317_p10, %s1059_s21), 15  ;;  %vm492_vm0 = vcmask 1043456   ;;  %vm467_vm1 = vcmask 31744   ;;  %p1340_p11 = scmp.ne.s32.totalorder %s1654_s25, %s1339_s17 }
  0x14   : > { %1163 = vmatprep.subr.mxu0 %v351_v0  ;;  %v348_v3 = vld [vmem:[%s1699_s1 + $0x60] sm:$0xff]  ;;  %s1060_s26 = sshll.u32 %s1714_s21, 3  ;;  %v347_v5 = vld [vmem:[%s1699_s1 + $0x58] sm:$0xff]  ;;  %v346_v8 = vld [vmem:[%s1699_s1 + $0x50] sm:$0xff]  ;;  %vm1402_vm2 = vmmov 0   ;;  %vm894_vm6 = vcmask 523264   ;;  %p1346_p0 = scmp.lt.s32.totalorder %s1654_s25, %s1344_s18 }
  0x15   : > { %1164 = vmatpush3.msra.mxu0 %v351_v0  ;;  %v466_v4 = vld [vmem:[%s1702_s4] sm:$0xf]  ;;  %s1519_s20 = scalar_lea.vmem %s1698_s0, %s1060_s26  ;;  %s1525_s21 = scalar_lea.vmem %s1700_s2, %s1060_s26  ;;  %v345_v10 = vld [vmem:[%s1699_s1 + $0x48] sm:$0xff]  ;;  %v343_v16 = vld [vmem:[%s1699_s1 + $0x38] sm:$0xff] }
  0x16   : > { %1165 = vmatprep.subr.mxu0 %v350_v1  ;;  %1207 = vmatprep.subr.msk.mxu1 %vm492_vm0, %v466_v4  ;;  %v465_v6 = vld [vmem:[%s1701_s3] sm:$0xf]  ;;  %v458_v11 = vld [vmem:[%s1525_s21 + $0x8] sm:$0xff]  ;;  %v459_v12 = vld [vmem:[%s1525_s21 + $0x10] sm:$0xff]  ;;  %p1341_p12 = pnand %p1340_p11, %p1487_p5  ;;  %s1345_s19 = scalar_lea.vmem %s1344_s18, 256 }
  0x17   : > { %1166 = vmatpush3.msra.mxu0 %v350_v1  ;;  %v328_v7 = vld [vmem:[%s1519_s20] sm:$0xff]  ;;  %1208 = vmatpush3.msk.msra.mxu1 %vm492_vm0, %v466_v4  ;;  %v460_v14 = vld [vmem:[%s1525_s21 + $0x18] sm:$0xff]  ;;  %v342_v17 = vld [vmem:[%s1699_s1 + $0x30] sm:$0xff]  ;;  %p1347_p1 = scmp.lt.s32.totalorder %s1345_s19, %s1339_s17 }
  0x18   : > { %1167 = vmatprep.subr.mxu0 %v349_v2  ;;  %1195 = vmatprep.mubr.f32.mxu0 %v328_v7  ;;  %v457_v9 = vld [vmem:[%s1525_s21] sm:$0xff]  ;;  %v462_v18 = vld [vmem:[%s1525_s21 + $0x28] sm:$0xff]  ;;  %v463_v19 = vld [vmem:[%s1525_s21 + $0x30] sm:$0xff]  ;;  %p1342_p13 = pneg %p1341_p12 }
  0x19   : > { %1168 = vmatpush3.msra.mxu0 %v349_v2  ;;  %1221 = vmatprep.subr.msk.mxu1 %vm492_vm0, %v465_v6  ;;  %v344_v13 = vld [vmem:[%s1699_s1 + $0x40] sm:$0xff]  ;;  %v341_v20 = vld [vmem:[%s1699_s1 + $0x28] sm:$0xff]  ;;  %v464_v22 = vld [vmem:[%s1525_s21 + $0x38] sm:$0xff]  ;;  %p1348_p2 = por %p1347_p1, %p1346_p0 }
  0x1a   : > { %1169 = vmatprep.subr.mxu0 %v348_v3  ;;  %1209 = vmatprep.mubr.msk.f32.mxu1 %vm467_vm1, %v457_v9  ;;  %v461_v15 = vld [vmem:[%s1525_s21 + $0x20] sm:$0xff]  ;;  %v339_v23 = vld [vmem:[%s1699_s1 + $0x18] sm:$0xff]  ;;  %v338_v24 = vld [vmem:[%s1699_s1 + $0x10] sm:$0xff] }
  0x1b   : > { %1170 = vmatpush3.msra.mxu0 %v348_v3  ;;  %1210 = vmatmul.mubr.msk.f32.vlgmr.msra.gmra.mxu1 %vm467_vm1, %v458_v11  ;;  %v340_v21 = vld [vmem:[%s1699_s1 + $0x20] sm:$0xff]  ;;  %v337_v25 = vld [vmem:[%s1699_s1 + $0x8] sm:$0xff]  ;;  %v330_v28 = vld [vmem:[%s1519_s20 + $0x10] sm:$0xff]  ;;  %p1349_p3 = pnand %p1348_p2, %p1342_p13 }
  0x1c   : > { %1171 = vmatprep.subr.mxu0 %v347_v5  ;;  %1212 = vmatprep.mubr.msk.f32.mxu1 %vm467_vm1, %v459_v12  ;;  %v336_v26 = vld [vmem:[%s1699_s1] sm:$0xff]  ;;  %v329_v27 = vld [vmem:[%s1519_s20 + $0x8] sm:$0xff]  ;;  %v331_v29 = vld [vmem:[%s1519_s20 + $0x18] sm:$0xff] }
  0x1d   : > { %1172 = vmatpush3.msra.mxu0 %v347_v5  ;;  %1222 = vmatpush3.msk.msra.mxu1 %vm492_vm0, %v465_v6  ;;  %v332_v30 = vld [vmem:[%s1519_s20 + $0x20] sm:$0xff]  ;;  %v333_v31 = vld [vmem:[%s1519_s20 + $0x28] sm:$0xff]  ;;  %v334_v32 = vld [vmem:[%s1519_s20 + $0x30] sm:$0xff] }
  0x1e   : > { %1173 = vmatprep.subr.mxu0 %v346_v8  ;;  %v335_v33 = vld [vmem:[%s1519_s20 + $0x38] sm:$0xff]  ;;  %v770_v37 = vld [vmem:[%s1704_s6 + $0x70] sm:$0xff]  ;;  %v769_v39 = vld [vmem:[%s1704_s6 + $0x68] sm:$0xff]  ;;  %s970_s20 = scalar_lea.sflag [#allocation3], %s313_s22 }
  0x1f   : > { %1174 = vmatpush3.msra.mxu0 %v346_v8  ;;  %1213 = vmatmul.mubr.msk.f32.gmra.mxu1 %vm467_vm1, %v460_v14  ;;  %v771_v34 = vld [vmem:[%s1704_s6 + $0x78] sm:$0xff]  ;;  %v768_v41 = vld [vmem:[%s1704_s6 + $0x60] sm:$0xff]  ;;  %v766_v45 = vld [vmem:[%s1704_s6 + $0x50] sm:$0xff] }
  0x20   : > { %1175 = vmatprep.subr.mxu0 %v345_v10  ;;  %1215 = vmatprep.mubr.msk.f32.mxu1 %vm467_vm1, %v461_v15  ;;  %v767_v43 = vld [vmem:[%s1704_s6 + $0x58] sm:$0xff]  ;;  %v765_v47 = vld [vmem:[%s1704_s6 + $0x48] sm:$0xff]  ;;  %v764_v49 = vld [vmem:[%s1704_s6 + $0x40] sm:$0xff] }
  0x21   : > { %1176 = vmatpush3.msra.mxu0 %v345_v10  ;;  %1235 = vmatprep.subr.mxu1 %v771_v34  ;;  %v763_v50 = vld [vmem:[%s1704_s6 + $0x38] sm:$0xff]  ;;  %v762_v51 = vld [vmem:[%s1704_s6 + $0x30] sm:$0xff]  ;;  %v761_v52 = vld [vmem:[%s1704_s6 + $0x28] sm:$0xff] }
  0x22   : > { %1177 = vmatprep.subr.mxu0 %v344_v13  ;;  %v760_v53 = vld [vmem:[%s1704_s6 + $0x20] sm:$0xff]  ;;  %v759_v54 = vld [vmem:[%s1704_s6 + $0x18] sm:$0xff]  ;;  %v758_v55 = vld [vmem:[%s1704_s6 + $0x10] sm:$0xff] }
  0x23   : > { %1178 = vmatpush3.msra.mxu0 %v344_v13  ;;  %1216 = vmatmul.mubr.msk.f32.gmra.mxu1 %vm467_vm1, %v462_v18  ;;  %v757_v56 = vld [vmem:[%s1704_s6 + $0x8] sm:$0xff]  ;;  %v756_v57 = vld [vmem:[%s1704_s6] sm:$0xff] }
  0x24   : > { %1179 = vmatprep.subr.mxu0 %v343_v16  ;;  %1218 = vmatprep.mubr.msk.f32.mxu1 %vm467_vm1, %v463_v19  ;;  %v1081_v4 = vld [vmem:[%s1703_s5] ss:$0 sm:$0xff] }
  0x25   : > { %1180 = vmatpush3.msra.mxu0 %v343_v16 }
  0x26   : > { %1181 = vmatprep.subr.mxu0 %v342_v17 }
  0x27   : > { %1182 = vmatpush3.msra.mxu0 %v342_v17  ;;  %1219 = vmatmul.mubr.msk.f32.gmra.mxu1 %vm467_vm1, %v464_v22 }
  0x28   : > { %1183 = vmatprep.subr.mxu0 %v341_v20 }
  0x29   : > { %1184 = vmatpush3.msra.mxu0 %v341_v20 }
  0x2a   : > { %1185 = vmatprep.subr.mxu0 %v340_v21 }
  0x2b   : > { %1186 = vmatpush3.msra.mxu0 %v340_v21 }
  0x2c   : > { %1187 = vmatprep.subr.mxu0 %v339_v23 }
  0x2d   : > { %1188 = vmatpush3.msra.mxu0 %v339_v23 }
  0x2e   : > { %1189 = vmatprep.subr.mxu0 %v338_v24 }
  0x2f   : > { %1190 = vmatpush3.msra.mxu0 %v338_v24 }
  0x30   : > { %1191 = vmatprep.subr.mxu0 %v337_v25 }
  0x31   : > { %1192 = vmatpush3.msra.mxu0 %v337_v25 }
  0x32   : > { %1193 = vmatprep.subr.mxu0 %v336_v26 }
  0x33   : > { %1194 = vmatpush3.msra.mxu0 %v336_v26 }
  0x34   : > { %1196 = vmatmul.mubr.f32.vlgmr.msra.gmra.mxu0 %v329_v27 }
  0x35   : > { %1198 = vmatprep.mubr.f32.mxu0 %v330_v28 }
  0x38   : > { %1199 = vmatmul.mubr.f32.gmra.mxu0 %v331_v29 }
  0x39   : > { %1201 = vmatprep.mubr.f32.mxu0 %v332_v30 }
  0x3c   : > { %1202 = vmatmul.mubr.f32.gmra.mxu0 %v333_v31 }
  0x3d   : > { %1204 = vmatprep.mubr.f32.mxu0 %v334_v32 }
  0x40   : > { %1205 = vmatmul.mubr.f32.gmra.mxu0 %v335_v33 }
  0xdb   : > { %v1211_v58 = vpop.f32.mrf.mxu1 }
  0xdd   : > { %v562_v59 = vpop.f32.mrf.mxu1 }
  0xdf   : > { %v1214_v60 = vpop.f32.mrf.mxu1 }
  0xe1   : > { %v572_v61 = vpop.f32.mrf.mxu1 }
  0xe3   : > { %v1217_v62 = vpop.f32.mrf.mxu1 }
  0xe5   : > { %v582_v63 = vpop.f32.mrf.mxu1 }
  0xe7   : > { %v1220_v0 = vpop.f32.mrf.mxu1 }
  0xe9   : > { %v592_v1 = vpop.f32.mrf.mxu1 }
  0xf4   : > { %v1197_v35 = vpop.f32.mrf.mxu0 }
  0xf6   : > { %v418_v36 = vpop.f32.mrf.mxu0 }
  0xf7   : > { %1223 = vmatprep.mubr.msk.f32.mxu1 %vm467_vm1, %v418_v36 }
  0xf8   : > { %v1200_v38 = vpop.f32.mrf.mxu0  ;;  %1224 = vmatmul.mubr.msk.f32.vlgmr.msra.gmra.mxu1 %vm467_vm1, %v1197_v35  ;;  %v1401_v35 = vmov 0.0  }
  0xf9   : > { %1236 = vmatpush3.msra.mxu1 %v771_v34  ;;  %1279 = vmatprep.subr.mxu0 %v1401_v35 }
  0xfa   : > { %v428_v40 = vpop.f32.mrf.mxu0  ;;  %1237 = vmatprep.subr.mxu1 %v770_v37  ;;  %1295 = vmatprep.mubr.msk.f32.mxu0 %vm1402_vm2, %v1401_v35 }
  0xfb   : > { %1226 = vmatprep.mubr.msk.f32.mxu1 %vm467_vm1, %v428_v40  ;;  %1238 = vmatpush3.msra.mxu1 %v770_v37 }
  0xfc   : > { %v1203_v42 = vpop.f32.mrf.mxu0  ;;  %1227 = vmatmul.mubr.msk.f32.gmra.mxu1 %vm467_vm1, %v1200_v38  ;;  %1239 = vmatprep.subr.mxu1 %v769_v39 }
  0xfd   : > { %1240 = vmatpush3.msra.mxu1 %v769_v39  ;;  %v884_v39 = vlaneseq }
  0xfe   : > { %v438_v44 = vpop.f32.mrf.mxu0  ;;  %1241 = vmatprep.subr.mxu1 %v768_v41 }
  0xff   : > { %1229 = vmatprep.mubr.msk.f32.mxu1 %vm467_vm1, %v438_v44  ;;  %1242 = vmatpush3.msra.mxu1 %v768_v41  ;;  %v1082_v44 = vld [vmem:[%s1705_s7] ss:$0 sm:$0xff] }
 0x100   : > { %v1206_v46 = vpop.f32.mrf.mxu0  ;;  %1230 = vmatmul.mubr.msk.f32.gmra.mxu1 %vm467_vm1, %v1203_v42  ;;  %1243 = vmatprep.subr.mxu1 %v767_v43  ;;  %v885_v42 = vshrl.u32 %v884_v39, 7 }
 0x101   : > { %1244 = vmatpush3.msra.mxu1 %v767_v43 }
 0x102   : > { %v448_v48 = vpop.f32.mrf.mxu0  ;;  %1245 = vmatprep.subr.mxu1 %v766_v45 }
 0x103   : > { %1232 = vmatprep.mubr.msk.f32.mxu1 %vm467_vm1, %v448_v48  ;;  %1246 = vmatpush3.msra.mxu1 %v766_v45 }
 0x104   : > { %1233 = vmatmul.mubr.msk.f32.gmra.mxu1 %vm467_vm1, %v1206_v46  ;;  %1247 = vmatprep.subr.mxu1 %v765_v47 }
 0x105   : > { %1248 = vmatpush3.msra.mxu1 %v765_v47  ;;  %v888_v47 = vmul.u32 8, %v885_v42 }
 0x106   : > { %1249 = vmatprep.subr.mxu1 %v764_v49 }
 0x107   : > { %1250 = vmatpush3.msra.mxu1 %v764_v49 }
 0x108   : > { %1251 = vmatprep.subr.mxu1 %v763_v50 }
 0x109   : > { %1252 = vmatpush3.msra.mxu1 %v763_v50 }
 0x10a   : > { %1253 = vmatprep.subr.mxu1 %v762_v51 }
 0x10b   : > { %1254 = vmatpush3.msra.mxu1 %v762_v51  ;;  %v887_v51 = vand.u32 127, %v884_v39 }
 0x10c   : > { %1255 = vmatprep.subr.mxu1 %v761_v52 }
 0x10d   : > { %1256 = vmatpush3.msra.mxu1 %v761_v52  ;;  %v890_v52 = vadd.s32 8, %v888_v47  ;;  %vm889_vm3 = vcmp.ge.s32.totalorder %v887_v51, %v888_v47 }
 0x10e   : > { %1257 = vmatprep.subr.mxu1 %v760_v53 }
 0x10f   : > { %1258 = vmatpush3.msra.mxu1 %v760_v53  ;;  %vm891_vm4 = vcmp.lt.s32.totalorder %v887_v51, %v890_v52 }
 0x110   : > { %1259 = vmatprep.subr.mxu1 %v759_v54  ;;  %vm892_vm5 = vmand %vm889_vm3, %vm891_vm4 }
 0x111   : > { %1260 = vmatpush3.msra.mxu1 %v759_v54 }
 0x112   : > { %1261 = vmatprep.subr.mxu1 %v758_v55 }
 0x113   : > { %1262 = vmatpush3.msra.mxu1 %v758_v55 }
 0x114   : > { %1263 = vmatprep.subr.mxu1 %v757_v56 }
 0x115   : > { %1264 = vmatpush3.msra.mxu1 %v757_v56 }
 0x116   : > { %1265 = vmatprep.subr.mxu1 %v756_v57 }
 0x117   : > { %1266 = vmatpush3.msra.mxu1 %v756_v57 }
 0x1b8   : > { %v1225_v2 = vpop.f32.mrf.mxu1 }
 0x1b9   : > { %v700_v3 = vadd.f32 %v1225_v2, %v1211_v58  ;;  %v893_v58 = vsel %vm892_vm5, 0.125, %v1401_v35 }
 0x1ba   : > { %v694_v5 = vpop.f32.mrf.mxu1 }
 0x1bb   : > { %v695_v6 = vadd.f32 %v694_v5, %v562_v59  ;;  %v741_v7 = vadd.f32 %v1081_v4, %v700_v3 }
 0x1bc   : > { %v1228_v8 = vpop.f32.mrf.mxu1 }
 0x1bd   : > { %v740_v9 = vadd.f32 %v1081_v4, %v695_v6  ;;  %v710_v10 = vadd.f32 %v1228_v8, %v1214_v60  ;;  %v749_v14 = vmax.f32 %v741_v7, 0.0 }
 0x1be   : > { %v704_v11 = vpop.f32.mrf.mxu1 }
 0x1bf   : > { %v748_v12 = vmax.f32 %v740_v9, 0.0  ;;  %v705_v13 = vadd.f32 %v704_v11, %v572_v61  ;;  %v743_v15 = vadd.f32 %v1081_v4, %v710_v10 }
 0x1c0   : > { %v1231_v16 = vpop.f32.mrf.mxu1 }
 0x1c1   : > { %v742_v17 = vadd.f32 %v1081_v4, %v705_v13  ;;  %v720_v18 = vadd.f32 %v1231_v16, %v1217_v62  ;;  %1267 = vmatprep.mubr.f32.mxu1 %v748_v12  ;;  %v751_v22 = vmax.f32 %v743_v15, 0.0 }
 0x1c2   : > { %v714_v19 = vpop.f32.mrf.mxu1  ;;  %1268 = vmatmul.mubr.f32.vlgmr.msra.gmra.mxu1 %v749_v14 }
 0x1c3   : > { %v750_v20 = vmax.f32 %v742_v17, 0.0  ;;  %v715_v21 = vadd.f32 %v714_v19, %v582_v63  ;;  %v745_v23 = vadd.f32 %v1081_v4, %v720_v18 }
 0x1c4   : > { %v1234_v24 = vpop.f32.mrf.mxu1 }
 0x1c5   : > { %v744_v25 = vadd.f32 %v1081_v4, %v715_v21  ;;  %v730_v26 = vadd.f32 %v1234_v24, %v1220_v0  ;;  %1270 = vmatprep.mubr.f32.mxu1 %v750_v20  ;;  %v753_v30 = vmax.f32 %v745_v23, 0.0 }
 0x1c6   : > { %v724_v27 = vpop.f32.mrf.mxu1  ;;  %1271 = vmatmul.mubr.f32.gmra.mxu1 %v751_v22 }
 0x1c7   : > { %v752_v28 = vmax.f32 %v744_v25, 0.0  ;;  %v725_v29 = vadd.f32 %v724_v27, %v592_v1  ;;  %v747_v31 = vadd.f32 %v1081_v4, %v730_v26 }
 0x1c9   : > { %v746_v32 = vadd.f32 %v1081_v4, %v725_v29  ;;  %1273 = vmatprep.mubr.f32.mxu1 %v752_v28  ;;  %v755_v34 = vmax.f32 %v747_v31, 0.0 }
 0x1ca   : > { %1274 = vmatmul.mubr.f32.gmra.mxu1 %v753_v30 }
 0x1cb   : > { %v754_v33 = vmax.f32 %v746_v32, 0.0 }
 0x1cd   : > { %1276 = vmatprep.mubr.f32.mxu1 %v754_v33 }
 0x1ce   : > { %1277 = vmatmul.mubr.f32.gmra.mxu1 %v755_v34 }
 0x282   : > { %v1269_v36 = vpop.f32.mrf.mxu1 }
 0x283   : > { %v851_v56 = vadd.f32 %v1269_v36, %v1082_v44 }
 0x284   : > { %v845_v37 = vpop.f32.mrf.mxu1 }
 0x285   : > { %v846_v57 = vadd.f32 %v1082_v44, %v845_v37 }
 0x286   : > { %v1272_v38 = vpop.f32.mrf.mxu1 }
 0x287   : > { %v861_v54 = vadd.f32 %v1272_v38, %v1082_v44 }
 0x288   : > { %v855_v40 = vpop.f32.mrf.mxu1 }
 0x289   : > { %v856_v55 = vadd.f32 %v1082_v44, %v855_v40 }
 0x28a   : > { %v1275_v41 = vpop.f32.mrf.mxu1 }
 0x28b   : > { %v871_v50 = vadd.f32 %v1275_v41, %v1082_v44 }
 0x28c   : > { %v865_v43 = vpop.f32.mrf.mxu1 }
 0x28d   : > { %v866_v53 = vadd.f32 %v1082_v44, %v865_v43 }
 0x28e   : > { %v1278_v45 = vpop.f32.mrf.mxu1 }
 0x28f   : > { %v881_v46 = vadd.f32 %v1278_v45, %v1082_v44 }
 0x290   : > { %v875_v48 = vpop.f32.mrf.mxu1 }
 0x291   : > { %v876_v49 = vadd.f32 %v1082_v44, %v875_v48  ;;  %1280 = vmatpush3.msra.mxu0 %v881_v46 }
 0x292   : > { %1281 = vmatprep.subr.mxu0 %v1401_v35 }
 0x293   : > { %1282 = vmatpush3.msra.mxu0 %v876_v49 }
 0x294   : > { %1283 = vmatprep.subr.mxu0 %v1401_v35 }
 0x295   : > { %1284 = vmatpush3.msra.mxu0 %v871_v50 }
 0x296   : > { %1285 = vmatprep.subr.mxu0 %v1401_v35 }
 0x297   : > { %1286 = vmatpush3.msra.mxu0 %v866_v53 }
 0x298   : > { %1287 = vmatprep.subr.mxu0 %v1401_v35 }
 0x299   : > { %1288 = vmatpush3.msra.mxu0 %v861_v54 }
 0x29a   : > { %1289 = vmatprep.subr.mxu0 %v1401_v35 }
 0x29b   : > { %1290 = vmatpush3.msra.mxu0 %v856_v55 }
 0x29c   : > { %1291 = vmatprep.subr.mxu0 %v1401_v35 }
 0x29d   : > { %1292 = vmatpush3.msra.mxu0 %v851_v56 }
 0x29e   : > { %1293 = vmatprep.subr.mxu0 %v1401_v35 }
 0x29f   : > { %1294 = vmatpush3.msra.mxu0 %v846_v57 }
 0x2a0   : > { %1296 = vmatmul.mubr.msk.f32.vlgmr.msra.gmra.mxu0 %vm894_vm6, %v893_v58 }
 0x360   : > { %v964_v59 = vpop.f32.mrf.mxu0 }
 0x361   : > { %968 = vst [vmem:[%s315_s24] sm:$0xff] %v964_v59 }
 0x362   : > { %v1297_v60 = vpop.f32.mrf.mxu0 }
 0x363   : > { %1352 = shalt.err (!%p1349_p3)
}
 0x364   : > { %s1353_s21 = scalar_lea.hbm %s1659_s13, 128  ;;  %s1357_s24 = scalar_lea.hbm %s1706_s8, 256 }
 0x365   : > { %p1354_p4 = scmp.ne.s32.totalorder %s1659_s13, %s1353_s21  ;;  %p1358_p9 = scmp.lt.s32.totalorder %s1659_s13, %s1706_s8 }
 0x366   : > { %p1359_p10 = scmp.lt.s32.totalorder %s1357_s24, %s1353_s21 }
 0x367   : > { %p1355_p7 = pnand %p1354_p4, %p1487_p5 }
 0x368   : > { %p1360_p11 = por %p1359_p10, %p1358_p9 }
 0x369   : > { %p1356_p8 = pneg %p1355_p7 }
 0x36b   : > { %p1361_p12 = pnand %p1360_p11, %p1356_p8 }
 0x36d   : > { %1364 = shalt.err (!%p1361_p12)
}
 0x36e   : > { %1298 = dma.vmem_to_hbm [thread:$0]  (%p1487_p5), %s1654_s25, 128, %s1659_s13, %s970_s20  }
 0x36f PF: > { %p1304_p13 = scmp.ge.s32.totalorder %s1399_s30, 2  ;;  %s995_s26 = sand.u32 1, %s1387_s27  }
 0x370   : > { %s996_s17 = scalar_lea.sflag [#allocation3], %s995_s26 }
 0x371   : > { %p1301_p0 = pnand %p1304_p13, %p1491_p6 }
 0x373   : > { %p1302_p1 = pneg %p1301_p0 }
 0x375   : > { %1382 = dma.done.wait (%p1302_p1), %s996_s17, 128  }
 0x376   : > { %1384 = vsyncadd (%p1302_p1), %s996_s17, 4294967168  ;;  %p18_p2 = scmp.ge.s32.totalorder %s1474_s11, 4   ;;  %s1709_s27 = smov %s1391_s28 }
 0x377   : > { %s1710_s28 = smov %s1395_s29  ;;  %s1711_s29 = smov %s1485_s14 }
 0x378   : > { %s1712_s30 = smov %s1474_s11  ;;  %20 = sbr.rel (!%p18_p2) target bundleno = 3 (0x3), region = 90 }
 0x37d   :  { %1001 = vsyncpa [#allocation3], 1 }
 0x37e   :  { %1003 = vsyncpa [#allocation3 + $0x1], 1 }

</bundles_post_ra>
